<compile_context>
chip_gen: v5e
topology: v5e:2x2
jax: 0.10.0
libtpu: 0.0.40
codegen_flags: <defaults>
</compile_context>

<pallas_src>
import jax
import jax.numpy as jnp
from jax.experimental import pallas as pl
from jax.experimental.pallas import tpu as pltpu


def _round_up(x: int, m: int) -> int:
    return ((x + m - 1) // m) * m


def _cdiv(a: int, b: int) -> int:
    return (a + b - 1) // b


def _pick_tile(full_128: int, block: int) -> int:
    """Largest multiple of 128 that divides `full_128` (a multiple of 128) and is <= block."""
    best = 128
    t = 128
    limit = min(block, full_128)
    while t <= limit:
        if full_128 % t == 0:
            best = t
        t += 128
    return best


def _linear_kernel(x_ref, w_ref, o_ref):
    # x_ref: (TM, K)   w_ref: (K, TN)   o_ref: (TM, TN); K is the full (small) reduction.
    o_ref[...] = jnp.dot(
        x_ref[...], w_ref[...], preferred_element_type=jnp.float32
    ).astype(o_ref.dtype)


def _linear_kernel_ktiled(x_ref, w_ref, o_ref, acc_ref):
    # Reduction over the K grid axis (last, "arbitrary"): accumulate in f32 VMEM scratch.
    @pl.when(pl.program_id(2) == 0)
    def _():
        acc_ref[...] = jnp.zeros_like(acc_ref)

    acc_ref[...] += jnp.dot(
        x_ref[...], w_ref[...], preferred_element_type=jnp.float32
    )

    @pl.when(pl.program_id(2) == pl.num_programs(2) - 1)
    def _():
        o_ref[...] = acc_ref[...].astype(o_ref.dtype)


class PallasLinear:
    """Bias-free linear layer (y = x @ W.T) with the padded, transposed RHS cached."""

    def __init__(self, weight, *, block_m: int = 512, block_n: int = 256,
                 block_k: int = 512, xla_fast_path_elems: int = 0):
        OUT, IN = weight.shape
        self.in_features = IN
        self.out_features = OUT
        self.block_m = block_m
        self.xla_fast_path_elems = xla_fast_path_elems

        # ---- N tiling: lane-dense output (multiple of 128), tile divides N exactly.
        N = _round_up(OUT, 128)
        TN = _pick_tile(N, block_n)
        self.N, self.TN = N, TN

        # ---- K handling: keep K un-padded & un-tiled when small (full-extent block).
        if IN <= block_k:
            self.tile_k = False
            K, TK = IN, IN
        else:
            self.tile_k = True
            K = _round_up(IN, 128)
            TK = _pick_tile(K, block_k)
            self.num_k_tiles = K // TK
        self.K, self.TK = K, TK

        # ---- One-time weight prep (hoisted out of the per-call path).
        w_t = weight.T  # (IN, OUT)
        if (K, N) != (IN, OUT):
            w_t = jnp.pad(w_t, ((0, K - IN), (0, N - OUT)))
        self.w_rhs = w_t              # (K, N), ready for MXU consumption
        self.weight = weight          # kept only for the optional XLA fast path

    def __call__(self, x):
        B, IN = x.shape
        assert IN == self.in_features, f"in_features mismatch: {IN} vs {self.in_features}"
        OUT = self.out_features

        # Tiny-problem fast path (single XLA op beats fixed pallas_call overhead).
        if self.xla_fast_path_elems and B * IN * OUT <= self.xla_fast_path_elems:
            return jnp.dot(
                x, self.weight.T, preferred_element_type=jnp.float32
            ).astype(x.dtype)

        K, N, TK, TN = self.K, self.N, self.TK, self.TN

        # Balanced batch tiles (multiples of 8 sublanes) -> minimal zero-row padding.
        nmt = _cdiv(B, self.block_m)
        TM = _round_up(_cdiv(B, nmt), 8)
        M = nmt * TM

        pad_rows = M - B
        pad_k = K - IN
        x_p = jnp.pad(x, ((0, pad_rows), (0, pad_k))) if (pad_rows or pad_k) else x

        itemsize = jnp.dtype(x.dtype).itemsize
        vmem_need = 2 * (TM * TK + TK * TN + TM * TN) * itemsize + TM * TN * 4
        vmem_limit = min(max(int(vmem_need * 2) + (4 << 20), 32 << 20), 64 << 20)

        if not self.tile_k:
            grid = (M // TM, N // TN)
            out_padded = pl.pallas_call(
                _linear_kernel,
                out_shape=jax.ShapeDtypeStruct((M, N), x.dtype),
                grid=grid,
                in_specs=[
                    # x: tiled along batch, full (small) K extent -> no K padding needed.
                    pl.BlockSpec((TM, K), lambda i, j: (i, 0)),
                    # weight: tiled along N only.
                    pl.BlockSpec((K, TN), lambda i, j: (0, j)),
                ],
                out_specs=pl.BlockSpec((TM, TN), lambda i, j: (i, j)),
                compiler_params=pltpu.CompilerParams(
                    dimension_semantics=("parallel", "parallel"),
                    vmem_limit_bytes=vmem_limit,
                ),
            )(x_p, self.w_rhs)
        else:
            grid = (M // TM, N // TN, K // TK)
            out_padded = pl.pallas_call(
                _linear_kernel_ktiled,
                out_shape=jax.ShapeDtypeStruct((M, N), x.dtype),
                grid=grid,
                in_specs=[
                    pl.BlockSpec((TM, TK), lambda i, j, k: (i, k)),
                    pl.BlockSpec((TK, TN), lambda i, j, k: (k, j)),
                ],
                out_specs=pl.BlockSpec((TM, TN), lambda i, j, k: (i, j)),
                scratch_shapes=[pltpu.VMEM((TM, TN), jnp.float32)],
                compiler_params=pltpu.CompilerParams(
                    dimension_semantics=("parallel", "parallel", "arbitrary"),
                    vmem_limit_bytes=vmem_limit,
                ),
            )(x_p, self.w_rhs)

        if M != B or N != OUT:
            out_padded = out_padded[:B, :OUT]
        return out_padded


def sample_model_forward(x, weight, **kwargs):
    """Convenience one-shot wrapper (prefer building PallasLinear once and reusing it)."""
    return PallasLinear(weight, **kwargs)(x)


if __name__ == "__main__":
    key = jax.random.PRNGKey(0)
    kx, kw, kx2, kw2 = jax.random.split(key, 4)

    # ---- Test 1: the SampleModel configuration from the original test
    # (f32, in=32, out=64, batch=8).  Fast path disabled so the Pallas
    # kernel itself runs (2-D grid, no K tiling).
    weights_dtype = jnp.float32
    input_size, output_size, batch = 32, 64, 8

    x = jax.random.normal(kx, (batch, input_size), dtype=weights_dtype)
    bound = 1.0 / (input_size ** 0.5)  # mimics nn.Linear's default init range
    weight = jax.random.uniform(
        kw, (output_size, input_size), dtype=weights_dtype,
        minval=-bound, maxval=bound,
    )

    model = PallasLinear(weight, xla_fast_path_elems=0)
    fwd = jax.jit(lambda xx: model(xx))
    out = jax.block_until_ready(fwd(x))

    ref = x @ weight.T
    assert out.shape == (batch, output_size)
    assert jnp.allclose(out, ref, atol=1e-5, rtol=1e-5), "test 1 mismatch"

    # ---- Test 2: exercise balanced batch tiles, exact N tiling and the
    # K-tiled accumulator path (in=640 > block_k=512, out=384, batch=300).
    in2, out2, b2 = 640, 384, 300
    x2 = jax.random.normal(kx2, (b2, in2), dtype=weights_dtype)
    bound2 = 1.0 / (in2 ** 0.5)
    w2 = jax.random.uniform(
        kw2, (out2, in2), dtype=weights_dtype, minval=-bound2, maxval=bound2,
    )
    model2 = PallasLinear(w2, block_m=512, block_n=256, block_k=512)
    out_2 = jax.block_until_ready(jax.jit(lambda xx: model2(xx))(x2))
    ref2 = x2 @ w2.T
    assert out_2.shape == (b2, out2)
    assert jnp.allclose(out_2, ref2, atol=2e-3, rtol=2e-3), "test 2 mismatch"

    # ---- Test 3: tiny-shape XLA fast path (no pallas_call) stays correct.
    model_fast = PallasLinear(weight, xla_fast_path_elems=1 << 16)
    out_fast = jax.block_until_ready(model_fast(x))
    assert jnp.allclose(out_fast, ref, atol=1e-5, rtol=1e-5), "fast path mismatch"

    print("KERNEL_OK")
</pallas_src>

<mosaic_0001>
module attributes {stable_mosaic.version = 11 : i64} {
  func.func @_linear_kernel(%arg0: i32, %arg1: i32, %arg2: memref<8x32xf32, #tpu.memory_space<vmem>>, %arg3: memref<32x128xf32, #tpu.memory_space<vmem>>, %arg4: memref<8x128xf32, #tpu.memory_space<vmem>>) attributes {dimension_semantics = [#tpu.dimension_semantics<parallel>, #tpu.dimension_semantics<parallel>], iteration_bounds = array<i64: 1, 1>, scalar_prefetch = 0 : i64, scratch_operands = 0 : i64, tpu.core_type = #tpu.core_type<tc>, window_params = [{transform_indices = @transform_0, window_bounds = array<i64: 8, 32>}, {transform_indices = @transform_1, window_bounds = array<i64: 32, 128>}, {transform_indices = @transform_2, window_bounds = array<i64: 8, 128>}]} {
    %c0 = arith.constant 0 : index
    %c0_0 = arith.constant 0 : index
    %0 = vector.load %arg2[%c0, %c0_0] : memref<8x32xf32, #tpu.memory_space<vmem>>, vector<8x32xf32>
    %c0_1 = arith.constant 0 : index
    %c0_2 = arith.constant 0 : index
    %1 = vector.load %arg3[%c0_1, %c0_2] : memref<32x128xf32, #tpu.memory_space<vmem>>, vector<32x128xf32>
    %cst = arith.constant dense<0.000000e+00> : vector<8x128xf32>
    %2 = tpu.matmul %0, %1, %cst {dimension_numbers = #tpu.dot_dimension_numbers<[1], [0], [0], [1], [0, 0, 1, 1], [], []>} : vector<8x32xf32>, vector<32x128xf32>, vector<8x128xf32> -> vector<8x128xf32>
    %c0_3 = arith.constant 0 : index
    %c0_4 = arith.constant 0 : index
    %3 = vector.load %arg4[%c0_3, %c0_4] : memref<8x128xf32, #tpu.memory_space<vmem>>, vector<8x128xf32>
    tpu.vector_store %arg4[%c0_3, %c0_4], %2 {strides = array<i32>} : memref<8x128xf32, #tpu.memory_space<vmem>>, vector<8x128xf32>,
    return
  }
  func.func @transform_0(%arg0: i32, %arg1: i32) -> (i32, i32) {
    %c0_i32 = arith.constant 0 : i32
    %c0_i32_0 = arith.constant 0 : i32
    return %arg0, %c0_i32 : i32, i32
  }
  func.func @transform_1(%arg0: i32, %arg1: i32) -> (i32, i32) {
    %c0_i32 = arith.constant 0 : i32
    %c0_i32_0 = arith.constant 0 : i32
    return %c0_i32, %arg1 : i32, i32
  }
  func.func @transform_2(%arg0: i32, %arg1: i32) -> (i32, i32) {
    %c0_i32 = arith.constant 0 : i32
    return %arg0, %arg1 : i32, i32
  }
}

</mosaic_0001>

<bundles_post_ra>
// kernel: _lambda_.1
= control target key start
LH: loop header
LB: loop body
LE: loop exit
PB: predicated region body
PF: predicated region fallthrough
CT: control target
= control target key end

     0   :  { %7 = vsyncpa [#allocation3], 0  ;;  %s203_s0 = inlined_call_operand.hbm [shape: f32[8,32], index: 0, kind: input, shape index: {}]   ;;  %s204_s1 = inlined_call_operand.hbm [shape: f32[32,128], index: 1, kind: input, shape index: {}]   ;;  %s205_s2 = inlined_call_operand.hbm [shape: f32[8,128], index: 2, kind: output, shape index: {}]  }
   0x1   :  { %8 = vsyncpa [#allocation6], 0 }
   0x2   :  { %9 = vsyncpa [#allocation4], 0  ;;  %s15_s11 = sshll.u32 %s203_s0, 4  ;;  %s174_s12 = smov [#allocation2]   ;;  %s16_s11 = int_to_ptr.hbm [resolvable:$true] %s15_s11 }
   0x3   :  { %s17_s13 = sshll.u32 %s174_s12, 4  ;;  %s25_s16 = sshll.u32 %s204_s1, 4  ;;  %s18_s13 = int_to_ptr.vmem [resolvable:$true] %s17_s13  ;;  %s26_s16 = int_to_ptr.hbm [resolvable:$true] %s25_s16 }
   0x4   :  { %20 = dma.hbm_to_vmem [thread:$0]  %s16_s11, 128, %s18_s13, [#allocation3]  }
   0x5   :  { %s175_s17 = smov [#allocation5]   ;;  %s176_s19 = smov 128  }
   0x6   :  { %s27_s18 = sshll.u32 %s175_s17, 4  ;;  %s177_s20 = smov 8   ;;  %s28_s18 = int_to_ptr.vmem [resolvable:$true] %s27_s18 }
   0x7   :  { %33 = dma.hbm_to_vmem [thread:$0]  %s26_s16, 512, %s28_s18, [#allocation6], %s176_s19, %s176_s19, %s177_s20  }
   0x8   :  { %168 = dma.done.wait [#allocation3], 128  }
   0x9   :  { %169 = vsyncadd [#allocation3], 4294967168 }
   0xa   :  { %170 = dma.done.wait [#allocation6], 512  }
   0xb   :  { %171 = vsyncadd [#allocation6], 4294966784  ;;  %v46_v0 = vld [vmem:[#allocation5 + $0x18] sm:$0xff]  ;;  %v45_v1 = vld [vmem:[#allocation5 + $0x10] sm:$0xff]  ;;  %vm47_vm0 = vcmask 261120   ;;  %s178_s0 = smov [#allocation7]  }
   0xc   :  { %63 = vmatpush.msra.mxu0 %v46_v0  ;;  %v44_v2 = vld [vmem:[#allocation5 + $0x8] sm:$0xff]  ;;  %v43_v3 = vld [vmem:[#allocation5] sm:$0xff]  ;;  %v42_v4 = vld [vmem:[#allocation2] sm:$0xff]  ;;  %s77_s1 = sshll.u32 %s178_s0, 4  ;;  %s79_s23 = sshll.u32 %s205_s2, 4  ;;  %s78_s1 = int_to_ptr.vmem [resolvable:$true] %s77_s1  ;;  %s80_s23 = int_to_ptr.hbm [resolvable:$true] %s79_s23 }
   0xe   :  { %64 = vmatpush.msra.mxu0 %v45_v1 }
  0x10   :  { %65 = vmatpush.msra.mxu0 %v44_v2 }
  0x12   :  { %66 = vmatpush.msra.mxu0 %v43_v3 }
  0x13   :  { %90 = vmatmul.msk.f32.vlgmr.msra.gmra.mxu0 %vm47_vm0, %v42_v4 }
  0x90   :  { %v68_v5 = vpop.f32.mrf.mxu0 }
  0x91   :  { %71 = vst [vmem:[#allocation7] sm:$0xff] %v68_v5 }
  0x92   :  { %82 = dma.vmem_to_hbm [thread:$0]  %s78_s1, 128, %s80_s23, [#allocation4]  }
  0x93   :  { %172 = dma.done.wait [#allocation4], 128  }
  0x94   :  { %173 = vsyncadd [#allocation4], 4294967168 }
  0x95   :  { %87 = vsyncpa [#allocation3], 1 }
  0x96   :  { %88 = vsyncpa [#allocation6], 1 }
  0x97   :  { %89 = vsyncpa [#allocation4], 1 }

</bundles_post_ra>
